<compile_context>
chip_gen: v5e
topology: v5e:2x2
jax: 0.10.0
libtpu: 0.0.40
codegen_flags: <defaults>
</compile_context>

<pallas_src>
import functools

import jax
import jax.numpy as jnp
from jax.experimental import pallas as pl
from jax.experimental.pallas import tpu as pltpu

LANES = 128


def _sublane_multiple(itemsize: int) -> int:
    # Native sublane packing: f32 -> 8, bf16/f16 -> 16, int8/fp8 -> 32.
    return max(8, 32 // max(1, itemsize))


def _has_two_tensorcores() -> bool:
    # v7x has 2 TensorCores per chip sharing HBM; v5e/v6e have 1.
    try:
        kind = jax.devices()[0].device_kind.lower()
    except Exception:
        return False
    return ("v7" in kind) or ("7x" in kind)


def _mse_partial_kernel(p_ref, a_ref, o_ref, *, row_tile, rows_valid,
                        steps_per_chunk, num_row_blocks, needs_edge_mask):
    i = pl.program_id(0)
    j = pl.program_id(1)

    @pl.when(j == 0)
    def _init():
        o_ref[...] = jnp.zeros_like(o_ref)

    # Hot loop: HBM stream stays in the input's native dtype; cast + subtract +
    # square are pure VPU elementwise work.
    diff = p_ref[...].astype(jnp.float32) - a_ref[...].astype(jnp.float32)
    sq = diff * diff

    def _fold(x):
        # (row_tile, 128) -> (8, 128): leading-axis sum is plain vreg adds
        # (no XLU), same add count as a tile-shaped accumulator but with no
        # big accumulator loads/stores.
        return x.reshape(row_tile // 8, 8, LANES).sum(axis=0)

    if needs_edge_mask:
        linear = i * steps_per_chunk + j

        @pl.when(linear < num_row_blocks - 1)
        def _interior():
            # Interior blocks: no iota/compare/select in the hot loop.
            o_ref[...] += _fold(sq)

        @pl.when(linear >= num_row_blocks - 1)
        def _edge():
            # Last (possibly ragged) block and any clamped duplicate steps:
            # zero the rows beyond the true row count (partial edge blocks
            # bring undefined data, and duplicate steps must contribute 0).
            local_rows = jax.lax.broadcasted_iota(
                jnp.int32, (row_tile, LANES), 0)
            valid = (linear * row_tile + local_rows) < rows_valid
            o_ref[...] += _fold(jnp.where(valid, sq, 0.0))
    else:
        o_ref[...] += _fold(sq)


def mse_loss(pred, actual, *, min_kernel_elems: int = 65536,
             max_row_tile: int | None = None, num_chunks: int | None = None):
    """torch.nn.MSELoss(reduction='mean') equivalent."""
    assert pred.shape == actual.shape, "MSELoss requires matching shapes"
    n = pred.size
    if n == 0:
        return jnp.float32(jnp.nan)   # matches torch on empty input

    p_item = jnp.dtype(pred.dtype).itemsize
    a_item = jnp.dtype(actual.dtype).itemsize
    sub_mult = max(_sublane_multiple(p_item), _sublane_multiple(a_item))

    # Small inputs: the pallas_call fixed cost dominates; a plain fused XLA
    # reduction is faster (and exact).
    if n < max(min_kernel_elems, 1) or (n // LANES) < sub_mult:
        d = pred.astype(jnp.float32) - actual.astype(jnp.float32)
        return (jnp.sum(d * d) / jnp.float32(n)).astype(jnp.float32)

    flat_p = pred.reshape(-1)
    flat_a = actual.reshape(-1)

    # Lane tail (< 128 elements) is reduced with a tiny XLA expression instead
    # of jnp.pad (which materializes a full padded copy of BOTH inputs in HBM).
    # In the common lane-aligned case there is no wrapper-side copy at all.
    tail = n % LANES
    main = n - tail
    if tail:
        # TODO(synk): for very large unaligned n, XLA may still materialize the
        # prefix slice below; a manual-DMA tail path would avoid even that.
        dt = (flat_p[main:].astype(jnp.float32)
              - flat_a[main:].astype(jnp.float32))
        tail_sum = jnp.sum(dt * dt)
        flat_p = flat_p[:main]
        flat_a = flat_a[:main]
    else:
        tail_sum = jnp.float32(0.0)

    rows = main // LANES
    p2d = flat_p.reshape(rows, LANES)
    a2d = flat_a.reshape(rows, LANES)

    # Row tile: biggest sublane-aligned tile under ~2 MiB per input block
    # (f32 -> 4096 rows, bf16 -> 8192). Each grid step then moves ~4 MiB of
    # HBM (>> ~0.35 us fixed per-step overhead) while 2 inputs x 2 pipeline
    # buffers stay ~8 MiB of VMEM, safe on v5e (128 MiB), v6e (128 MiB) and
    # v7x (64 MiB per TensorCore).
    if max_row_tile is None:
        target_block_bytes = 2 << 20
        max_row_tile = max(
            sub_mult,
            (target_block_bytes // (LANES * max(p_item, a_item)))
            // sub_mult * sub_mult)
    row_tile = max(sub_mult, min(max_row_tile, (rows // sub_mult) * sub_mult))
    num_row_blocks = pl.cdiv(rows, row_tile)

    # Leading "parallel" chunk axis: only worth it where 2 TensorCores share
    # HBM (v7x). On single-TC chips it would just add masking + a duplicate
    # clamped-block DMA for zero benefit.
    if num_chunks is None:
        num_chunks = 2 if _has_two_tensorcores() else 1
    num_chunks = max(1, min(num_chunks, num_row_blocks))
    steps_per_chunk = pl.cdiv(num_row_blocks, num_chunks)

    needs_edge_mask = (rows % row_tile != 0) or \
                      (num_chunks * steps_per_chunk != num_row_blocks)

    def in_index_map(i, j):
        # Clamp over-covered grid points (possible only when num_chunks > 1)
        # to the last block; the kernel fully masks their contribution.
        return (jnp.minimum(i * steps_per_chunk + j, num_row_blocks - 1), 0)

    kernel = functools.partial(
        _mse_partial_kernel,
        row_tile=row_tile,
        rows_valid=rows,
        steps_per_chunk=steps_per_chunk,
        num_row_blocks=num_row_blocks,
        needs_edge_mask=needs_edge_mask,
    )

    block_bytes = row_tile * LANES * (p_item + a_item)
    cost = pl.CostEstimate(
        flops=3 * main,
        transcendentals=0,
        bytes_accessed=main * (p_item + a_item) + num_chunks * 8 * LANES * 4,
    )

    partials = pl.pallas_call(
        kernel,
        out_shape=jax.ShapeDtypeStruct((num_chunks * 8, LANES), jnp.float32),
        grid_spec=pltpu.PrefetchScalarGridSpec(
            num_scalar_prefetch=0,
            grid=(num_chunks, steps_per_chunk),
            in_specs=[
                # NOTE: pipeline_mode=pl.Buffered(3) is a cheap sweep once
                # measured on HW; default double-buffering kept here.
                pl.BlockSpec((row_tile, LANES), in_index_map),
                pl.BlockSpec((row_tile, LANES), in_index_map),
            ],
            # Output block index depends only on the chunk axis -> resident
            # (8, 128) accumulator across the reduction axis, lane-dense store.
            out_specs=pl.BlockSpec((8, LANES), lambda i, j: (i, 0)),
        ),
        compiler_params=pltpu.CompilerParams(
            dimension_semantics=("parallel", "arbitrary"),
            # 2 double-buffered inputs + resident output block + headroom.
            vmem_limit_bytes=int(2 * block_bytes + (8 << 20)),
        ),
        cost_estimate=cost,
    )(p2d, a2d)

    total = jnp.sum(partials) + tail_sum
    return (total / jnp.float32(n)).astype(jnp.float32)


if __name__ == "__main__":
    key = jax.random.PRNGKey(0)
    k1, k2, k3, k4, k5, k6, k7, k8 = jax.random.split(key, 8)

    # Primary example (module-consistent small shape); force the kernel path.
    shape = (2, 4, 16, 16)
    pred = jax.random.normal(k1, shape, dtype=jnp.float32)
    actual = jax.random.normal(k2, shape, dtype=jnp.float32)
    loss = mse_loss(pred, actual, min_kernel_elems=0)
    jax.block_until_ready(loss)
    ref = jnp.mean((pred - actual) ** 2)
    assert jnp.allclose(loss, ref, rtol=1e-5, atol=1e-6), (loss, ref)

    # Default behavior (small-n fallback) must agree as well.
    loss_auto = mse_loss(pred, actual)
    jax.block_until_ready(loss_auto)
    assert jnp.allclose(loss_auto, ref, rtol=1e-5, atol=1e-6), (loss_auto, ref)

    # Unaligned sizes: no-pad lane-tail path + ragged edge block row mask.
    shape2 = (3, 5, 7, 97)
    p2 = jax.random.normal(k3, shape2, dtype=jnp.float32)
    a2 = jax.random.normal(k4, shape2, dtype=jnp.float32)
    loss2 = mse_loss(p2, a2, min_kernel_elems=0)
    jax.block_until_ready(loss2)
    ref2 = jnp.mean((p2 - a2) ** 2)
    assert jnp.allclose(loss2, ref2, rtol=1e-5, atol=1e-6), (loss2, ref2)

    # Multi-block + forced 2-chunk parallel grid (clamped duplicate step +
    # ragged edge block), correct on any TPU generation.
    shape3 = (40, 512)
    p3 = jax.random.normal(k5, shape3, dtype=jnp.float32)
    a3 = jax.random.normal(k6, shape3, dtype=jnp.float32)
    loss3 = mse_loss(p3, a3, min_kernel_elems=0, max_row_tile=64, num_chunks=2)
    jax.block_until_ready(loss3)
    ref3 = jnp.mean((p3 - a3) ** 2)
    assert jnp.allclose(loss3, ref3, rtol=1e-5, atol=1e-6), (loss3, ref3)

    # bf16 inputs: 16-row sublane tiles, f32 accumulation in-kernel.
    shape4 = (4, 8, 32, 32)
    p4 = jax.random.normal(k7, shape4, dtype=jnp.bfloat16)
    a4 = jax.random.normal(k8, shape4, dtype=jnp.bfloat16)
    loss4 = mse_loss(p4, a4, min_kernel_elems=0)
    jax.block_until_ready(loss4)
    ref4 = jnp.mean((p4.astype(jnp.float32) - a4.astype(jnp.float32)) ** 2)
    assert jnp.allclose(loss4, ref4, rtol=1e-5, atol=1e-6), (loss4, ref4)

    print("KERNEL_OK")
</pallas_src>

<mosaic_0001>
module attributes {stable_mosaic.version = 11 : i64} {
  func.func @_mse_partial_kernel(%arg0: i32, %arg1: i32, %arg2: memref<16x128xf32, #tpu.memory_space<vmem>>, %arg3: memref<16x128xf32, #tpu.memory_space<vmem>>, %arg4: memref<8x128xf32, #tpu.memory_space<vmem>>) attributes {dimension_semantics = [#tpu.dimension_semantics<parallel>, #tpu.dimension_semantics<arbitrary>], iteration_bounds = array<i64: 1, 1>, scalar_prefetch = 0 : i64, scratch_operands = 0 : i64, tpu.core_type = #tpu.core_type<tc>, window_params = [{transform_indices = @transform_0, window_bounds = array<i64: 16, 128>}, {transform_indices = @transform_1, window_bounds = array<i64: 16, 128>}, {transform_indices = @transform_2, window_bounds = array<i64: 8, 128>}]} {
    %c0_i32 = arith.constant 0 : i32
    %0 = arith.cmpi eq, %arg1, %c0_i32 : i32
    %1 = arith.extui %0 : i1 to i32
    %c0_i32_0 = arith.constant 0 : i32
    %2 = arith.cmpi ne, %1, %c0_i32_0 : i32
    scf.if %2 {
      %cst_8 = arith.constant 0.000000e+00 : f32
      %12 = vector.broadcast %cst_8 : f32 to vector<8x128xf32>
      %c0_9 = arith.constant 0 : index
      %c0_10 = arith.constant 0 : index
      %13 = vector.load %arg4[%c0_9, %c0_10] : memref<8x128xf32, #tpu.memory_space<vmem>>, vector<8x128xf32>
      tpu.vector_store %arg4[%c0_9, %c0_10], %12 {strides = array<i32>} : memref<8x128xf32, #tpu.memory_space<vmem>>, vector<8x128xf32>,
    } else {
    }
    %c0 = arith.constant 0 : index
    %c0_1 = arith.constant 0 : index
    %3 = vector.load %arg2[%c0, %c0_1] : memref<16x128xf32, #tpu.memory_space<vmem>>, vector<16x128xf32>
    %c0_2 = arith.constant 0 : index
    %c0_3 = arith.constant 0 : index
    %4 = vector.load %arg3[%c0_2, %c0_3] : memref<16x128xf32, #tpu.memory_space<vmem>>, vector<16x128xf32>
    %5 = arith.subf %3, %4 : vector<16x128xf32>
    %6 = arith.mulf %5, %5 : vector<16x128xf32>
    %c0_4 = arith.constant 0 : index
    %c0_5 = arith.constant 0 : index
    %7 = vector.load %arg4[%c0_4, %c0_5] : memref<8x128xf32, #tpu.memory_space<vmem>>, vector<8x128xf32>
    %8 = vector.shape_cast %6 : vector<16x128xf32> to vector<2x8x128xf32>
    %cst = arith.constant dense<0.000000e+00> : vector<8x128xf32>
    %9 = vector.multi_reduction <add>, %8, %cst [0] : vector<2x8x128xf32> to vector<8x128xf32>
    %10 = arith.addf %7, %9 : vector<8x128xf32>
    %c0_6 = arith.constant 0 : index
    %c0_7 = arith.constant 0 : index
    %11 = vector.load %arg4[%c0_6, %c0_7] : memref<8x128xf32, #tpu.memory_space<vmem>>, vector<8x128xf32>
    tpu.vector_store %arg4[%c0_6, %c0_7], %10 {strides = array<i32>} : memref<8x128xf32, #tpu.memory_space<vmem>>, vector<8x128xf32>,
    return
  }
  func.func @transform_0(%arg0: i32, %arg1: i32) -> (i32, i32) {
    %c1_i32 = arith.constant 1 : i32
    %0 = arith.muli %arg0, %c1_i32 : i32
    %1 = arith.addi %0, %arg1 : i32
    %c0_i32 = arith.constant 0 : i32
    %2 = arith.minsi %1, %c0_i32 : i32
    %c0_i32_0 = arith.constant 0 : i32
    %c0_i32_1 = arith.constant 0 : i32
    return %2, %c0_i32_0 : i32, i32
  }
  func.func @transform_1(%arg0: i32, %arg1: i32) -> (i32, i32) {
    %c1_i32 = arith.constant 1 : i32
    %0 = arith.muli %arg0, %c1_i32 : i32
    %1 = arith.addi %0, %arg1 : i32
    %c0_i32 = arith.constant 0 : i32
    %2 = arith.minsi %1, %c0_i32 : i32
    %c0_i32_0 = arith.constant 0 : i32
    %c0_i32_1 = arith.constant 0 : i32
    return %2, %c0_i32_0 : i32, i32
  }
  func.func @transform_2(%arg0: i32, %arg1: i32) -> (i32, i32) {
    %c0_i32 = arith.constant 0 : i32
    %c0_i32_0 = arith.constant 0 : i32
    return %arg0, %c0_i32 : i32, i32
  }
}

</mosaic_0001>

<bundles_post_ra>
// kernel: tpu_custom_call.1
= control target key start
LH: loop header
LB: loop body
LE: loop exit
PB: predicated region body
PF: predicated region fallthrough
CT: control target
= control target key end

     0   :  { %7 = vsyncpa [#allocation3], 0  ;;  %s216_s0 = inlined_call_operand.hbm [shape: f32[16,128], index: 0, kind: input, shape index: {}]   ;;  %s217_s1 = inlined_call_operand.hbm [shape: f32[16,128], index: 1, kind: input, shape index: {}]   ;;  %s218_s2 = inlined_call_operand.hbm [shape: f32[8,128], index: 2, kind: output, shape index: {}]  }
   0x1   :  { %8 = vsyncpa [#allocation6], 0 }
   0x2   :  { %9 = vsyncpa [#allocation4], 0  ;;  %s20_s11 = sshll.u32 %s216_s0, 4  ;;  %s187_s12 = smov [#allocation2]   ;;  %s21_s11 = int_to_ptr.hbm [resolvable:$true] %s20_s11 }
   0x3   :  { %s22_s13 = sshll.u32 %s187_s12, 4  ;;  %s39_s16 = sshll.u32 %s217_s1, 4  ;;  %s23_s13 = int_to_ptr.vmem [resolvable:$true] %s22_s13  ;;  %s40_s16 = int_to_ptr.hbm [resolvable:$true] %s39_s16 }
   0x4   :  { %s188_s17 = smov 128   ;;  %s189_s18 = smov 8  }
   0x5   :  { %28 = dma.hbm_to_vmem [thread:$0]  %s21_s11, 256, %s23_s13, [#allocation3], %s188_s17, %s188_s17, %s189_s18  }
   0x6   :  { %s190_s19 = smov [#allocation5]  }
   0x7   :  { %s41_s20 = sshll.u32 %s190_s19, 4  ;;  %s42_s20 = int_to_ptr.vmem [resolvable:$true] %s41_s20 }
   0x8   :  { %47 = dma.hbm_to_vmem [thread:$0]  %s40_s16, 256, %s42_s20, [#allocation6], %s188_s17, %s188_s17, %s189_s18  }
   0x9   :  { %181 = dma.done.wait [#allocation3], 256  }
   0xa   :  { %182 = vsyncadd [#allocation3], 4294967040 }
   0xb   :  { %183 = dma.done.wait [#allocation6], 256  }
   0xc   :  { %184 = vsyncadd [#allocation6], 4294967040  ;;  %v69_v0 = vld [vmem:[#allocation2] sm:$0xff]  ;;  %v70_v1 = vld [vmem:[#allocation2 + $0x8] sm:$0xff]  ;;  %s191_s0 = smov [#allocation7]   ;;  %s88_s23 = sshll.u32 %s218_s2, 4  ;;  %s89_s23 = int_to_ptr.hbm [resolvable:$true] %s88_s23 }
   0xd   :  { %v71_v2 = vld [vmem:[#allocation5] sm:$0xff]  ;;  %v72_v3 = vld [vmem:[#allocation5 + $0x8] sm:$0xff]  ;;  %s86_s1 = sshll.u32 %s191_s0, 4  ;;  %s87_s1 = int_to_ptr.vmem [resolvable:$true] %s86_s1 }
   0xe   :  { %v73_v4 = vsub.f32 %v69_v0, %v71_v2  ;;  %v74_v5 = vsub.f32 %v70_v1, %v72_v3 }
  0x10   :  { %v75_v6 = vmul.f32 %v73_v4, %v73_v4  ;;  %v76_v7 = vmul.f32 %v74_v5, %v74_v5 }
  0x12   :  { %v78_v8 = vadd.f32 %v76_v7, %v75_v6 }
  0x14   :  { %80 = vst [vmem:[#allocation7] sm:$0xff] %v78_v8 }
  0x15   :  { %91 = dma.vmem_to_hbm [thread:$0]  %s87_s1, 128, %s89_s23, [#allocation4]  }
  0x16   :  { %185 = dma.done.wait [#allocation4], 128  }
  0x17   :  { %186 = vsyncadd [#allocation4], 4294967168 }
  0x18   :  { %96 = vsyncpa [#allocation3], 1 }
  0x19   :  { %97 = vsyncpa [#allocation6], 1 }
  0x1a   :  { %98 = vsyncpa [#allocation4], 1 }

</bundles_post_ra>
